<compile_context>
chip_gen: v7x
topology: tpu7x:2x2x1
jax: 0.10.0
libtpu: 0.0.40
codegen_flags: <defaults>
</compile_context>

<pallas_src>
import functools

import jax
import jax.numpy as jnp
from jax import lax
from jax.experimental import pallas as pl
from jax.experimental.pallas import tpu as pltpu


# ----------------------------------------------------------------------------
# Scalar loss-only kernel (primal path): SMEM in, SMEM out, scalar ALU only.
# ----------------------------------------------------------------------------
def _rosenbrock_loss_kernel(x_ref, loss_ref):
    # x_ref: SMEM (2,) f32 ; loss_ref: SMEM (1,) f32
    x0 = x_ref[0]
    x1 = x_ref[1]
    r = jnp.float32(1.0) - x0
    d = x1 - x0 * x0
    loss_ref[0] = r * r + jnp.float32(100.0) * d * d


def _rosenbrock_loss(x_param: jax.Array) -> jax.Array:
    x_param = x_param.astype(jnp.float32)
    loss = pl.pallas_call(
        _rosenbrock_loss_kernel,
        out_shape=jax.ShapeDtypeStruct((1,), jnp.float32),
        in_specs=[pl.BlockSpec(memory_space=pltpu.SMEM)],
        out_specs=pl.BlockSpec(memory_space=pltpu.SMEM),
        cost_estimate=pl.CostEstimate(flops=8, transcendentals=0,
                                      bytes_accessed=12),
    )(x_param)
    return loss.reshape(())


# ----------------------------------------------------------------------------
# Fused loss + analytic gradient kernel (used only by custom_vjp fwd).
# Single packed 1-D SMEM output: [loss, dL/dx0, dL/dx1, pad].
# ----------------------------------------------------------------------------
def _rosenbrock_fused_kernel(x_ref, out_ref):
    # x_ref: SMEM (2,) f32 ; out_ref: SMEM (4,) f32
    x0 = x_ref[0]
    x1 = x_ref[1]
    r = jnp.float32(1.0) - x0
    d = x1 - x0 * x0
    out_ref[0] = r * r + jnp.float32(100.0) * d * d
    out_ref[1] = jnp.float32(-2.0) * r - jnp.float32(400.0) * x0 * d
    out_ref[2] = jnp.float32(200.0) * d
    out_ref[3] = jnp.float32(0.0)


def _rosenbrock_value_and_grad(x_param: jax.Array):
    x_param = x_param.astype(jnp.float32)
    packed = pl.pallas_call(
        _rosenbrock_fused_kernel,
        out_shape=jax.ShapeDtypeStruct((4,), jnp.float32),
        in_specs=[pl.BlockSpec(memory_space=pltpu.SMEM)],
        out_specs=pl.BlockSpec(memory_space=pltpu.SMEM),
        cost_estimate=pl.CostEstimate(flops=16, transcendentals=0,
                                      bytes_accessed=24),
    )(x_param)
    return packed[0], packed[1:3]


@jax.custom_vjp
def rosenbrock_pallas(x_param: jax.Array) -> jax.Array:
    """forward() of SimpleModel: (1 - x[0])**2 + 100*(x[1] - x[0]**2)**2."""
    return _rosenbrock_loss(x_param)


def _rosenbrock_fwd(x_param):
    loss, grad = _rosenbrock_value_and_grad(x_param)
    return loss, grad


def _rosenbrock_bwd(grad, g):
    return (g * grad,)


rosenbrock_pallas.defvjp(_rosenbrock_fwd, _rosenbrock_bwd)


# ----------------------------------------------------------------------------
# Fused K-step SGD optimizer kernel: the whole training loop in ONE launch.
# Parameter lives in SMEM; updated in place via input_output_aliases.
# ----------------------------------------------------------------------------
def _rosenbrock_sgd_kernel(num_steps, lr, x_ref, x_out_ref):
    lr = jnp.float32(lr)

    def body(_, carry):
        x0, x1 = carry
        r = jnp.float32(1.0) - x0
        d = x1 - x0 * x0
        g0 = jnp.float32(-2.0) * r - jnp.float32(400.0) * x0 * d
        g1 = jnp.float32(200.0) * d
        return (x0 - lr * g0, x1 - lr * g1)

    x0, x1 = lax.fori_loop(0, num_steps, body, (x_ref[0], x_ref[1]))
    x_out_ref[0] = x0
    x_out_ref[1] = x1


def rosenbrock_sgd_steps(x_param: jax.Array, *, num_steps: int,
                         lr: float) -> jax.Array:
    """Run `num_steps` SGD steps on the Rosenbrock loss inside one pallas_call."""
    x_param = x_param.astype(jnp.float32)
    return pl.pallas_call(
        functools.partial(_rosenbrock_sgd_kernel, num_steps, lr),
        out_shape=jax.ShapeDtypeStruct((2,), jnp.float32),
        in_specs=[pl.BlockSpec(memory_space=pltpu.SMEM)],
        out_specs=pl.BlockSpec(memory_space=pltpu.SMEM),
        input_output_aliases={0: 0},
        cost_estimate=pl.CostEstimate(flops=20 * num_steps,
                                      transcendentals=0, bytes_accessed=16),
    )(x_param)


# ----------------------------------------------------------------------------
# Batched lane-dense VPU kernel: grid-tiled over rows, stacked (2, M, C) input,
# bf16 accepted and cast in-kernel, f32 output.
# ----------------------------------------------------------------------------
def _rosenbrock_batched_kernel(x_ref, o_ref):
    # x_ref: VMEM (2, tm, C) ; o_ref: VMEM (tm, C) f32
    x0 = x_ref[0].astype(jnp.float32)
    x1 = x_ref[1].astype(jnp.float32)
    r = 1.0 - x0
    d = x1 - x0 * x0
    o_ref[...] = r * r + 100.0 * d * d


def rosenbrock_pallas_batched(x_stacked: jax.Array, *, tm: int | None = None
                              ) -> jax.Array:
    """Evaluate Rosenbrock at many points.

    x_stacked: (2, M, C) array (bf16 or f32); [0] = x0, [1] = x1.
    M must be a multiple of the row tile (default min(M, 256), itself a
    multiple of 8); C must be a multiple of 128.
    """
    _, rows, cols = x_stacked.shape
    assert rows % 8 == 0 and cols % 128 == 0, "last two dims must tile (8,128)"
    if tm is None:
        tm = min(rows, 256)
    assert rows % tm == 0

    n = rows * cols
    in_bytes = 2 * n * x_stacked.dtype.itemsize
    out_bytes = 4 * n
    return pl.pallas_call(
        _rosenbrock_batched_kernel,
        out_shape=jax.ShapeDtypeStruct((rows, cols), jnp.float32),
        grid_spec=pltpu.PrefetchScalarGridSpec(
            num_scalar_prefetch=0,
            grid=(rows // tm,),
            in_specs=[pl.BlockSpec((2, tm, cols), lambda i: (0, i, 0))],
            out_specs=pl.BlockSpec((tm, cols), lambda i: (i, 0)),
        ),
        compiler_params=pltpu.CompilerParams(
            dimension_semantics=("parallel",)),
        cost_estimate=pl.CostEstimate(flops=8 * n, transcendentals=0,
                                      bytes_accessed=in_bytes + out_bytes),
    )(x_stacked)


if __name__ == "__main__":
    # SimpleModel.__init__ sets the parameter deterministically to [-1.0, 1.0].
    x_param = jnp.array([-1.0, 1.0], dtype=jnp.float32)

    def ref_loss(p):
        return (1.0 - p[0]) ** 2 + 100.0 * (p[1] - p[0] ** 2) ** 2

    # --- forward (matches SimpleModel.forward) ---
    loss = rosenbrock_pallas(x_param)
    jax.block_until_ready(loss)
    assert jnp.allclose(loss, ref_loss(x_param), rtol=1e-6, atol=1e-6), loss

    # --- analytic gradient via custom_vjp (fused single pallas_call) ---
    grad = jax.grad(rosenbrock_pallas)(x_param)
    jax.block_until_ready(grad)
    grad_ref = jax.grad(ref_loss)(x_param)
    assert jnp.allclose(grad, grad_ref, rtol=1e-5, atol=1e-5), (grad, grad_ref)

    # --- fused K-step SGD loop in ONE pallas_call (param aliased in place) ---
    num_steps, lr = 100, 1e-3
    x_new = rosenbrock_sgd_steps(x_param, num_steps=num_steps, lr=lr)
    jax.block_until_ready(x_new)

    def ref_sgd(p):
        def body(_, q):
            return q - lr * jax.grad(ref_loss)(q)
        return lax.fori_loop(0, num_steps, body, p)

    x_ref_sgd = ref_sgd(x_param)
    assert jnp.allclose(x_new, x_ref_sgd, rtol=1e-4, atol=1e-4), (x_new, x_ref_sgd)
    # loss must have decreased after the fused optimizer steps
    assert ref_loss(x_new) < ref_loss(x_param)

    # --- batched lane-dense VPU path (grid-tiled, bf16 in, f32 out) ---
    key = jax.random.PRNGKey(0)
    k0, k1 = jax.random.split(key)
    rows, cols, tile_rows = 32, 256, 8          # small demo shapes, grid=(4,)
    x0_b = jax.random.normal(k0, (rows, cols), dtype=jnp.float32)
    x1_b = jax.random.normal(k1, (rows, cols), dtype=jnp.float32)
    x_stacked = jnp.stack([x0_b, x1_b]).astype(jnp.bfloat16)
    batched = rosenbrock_pallas_batched(x_stacked, tm=tile_rows)
    jax.block_until_ready(batched)
    x0_f = x_stacked[0].astype(jnp.float32)
    x1_f = x_stacked[1].astype(jnp.float32)
    batched_ref = (1.0 - x0_f) ** 2 + 100.0 * (x1_f - x0_f ** 2) ** 2
    assert jnp.allclose(batched, batched_ref, rtol=1e-5, atol=1e-5)

    print("KERNEL_OK")
</pallas_src>

<mosaic_0001>
module attributes {stable_mosaic.version = 11 : i64} {
  func.func @_rosenbrock_loss_kernel(%arg0: memref<2xf32, #tpu.memory_space<smem>>, %arg1: memref<1xf32, #tpu.memory_space<smem>>) attributes {dimension_semantics = [], scalar_prefetch = 0 : i64, scratch_operands = 0 : i64, tpu.core_type = #tpu.core_type<tc>} {
    %c0 = arith.constant 0 : index
    %0 = memref.load %arg0[%c0] : memref<2xf32, #tpu.memory_space<smem>>
    %c1 = arith.constant 1 : index
    %1 = memref.load %arg0[%c1] : memref<2xf32, #tpu.memory_space<smem>>
    %cst = arith.constant 1.000000e+00 : f32
    %2 = arith.subf %cst, %0 : f32
    %3 = arith.mulf %0, %0 : f32
    %4 = arith.subf %1, %3 : f32
    %5 = arith.mulf %2, %2 : f32
    %cst_0 = arith.constant 1.000000e+02 : f32
    %6 = arith.mulf %cst_0, %4 : f32
    %7 = arith.mulf %6, %4 : f32
    %8 = arith.addf %5, %7 : f32
    %c0_1 = arith.constant 0 : index
    %9 = memref.load %arg1[%c0_1] : memref<1xf32, #tpu.memory_space<smem>>
    memref.store %8, %arg1[%c0_1] : memref<1xf32, #tpu.memory_space<smem>>
    return
  }
}

</mosaic_0001>

<bundles_post_ra>
// kernel: tpu_custom_call.1
= control target key start
LH: loop header
LB: loop body
LE: loop exit
PB: predicated region body
PF: predicated region fallthrough
CT: control target
= control target key end

     0   :  { %6 = vsyncpa [#allocation3], 0  ;;  %s108_s0 = inlined_call_operand.hbm [shape: f32[2], index: 0, kind: input, shape index: {}]   ;;  %s109_s1 = inlined_call_operand.hbm [shape: f32[1], index: 1, kind: output, shape index: {}]  }
   0x1   :  { %7 = vsyncpa [#allocation4], 0  ;;  %s48_s8 = scalar_lea.hbm %s108_s0, 16 }
   0x2   :  { %p49_p0 = scmp.ne.s32.totalorder %s108_s0, %s48_s8  ;;  %p52_p1 = scmp.lt.u32.totalorder %s48_s8, %s108_s0 }
   0x4   :  { %p54_p2 = pnand %p52_p1, %p49_p0 }
   0x6   :  { %57 = shalt.err (!%p54_p2)
}
   0x7   :  { %s72_s13 = smov [#allocation2]  }
   0x8   :  { %15 = dma.hbm_to_smem %s108_s0, 16, %s72_s13, [#allocation3]  }
   0x9   :  { %68 = dma.done.wait [#allocation3], 16  }
   0xa   :  { %69 = vsyncadd [#allocation3], 4294967280 }
   0xb   :  { %19 = sfence }
   0xc   :  { %s20_s16 = sld [smem:[#allocation2]]  ;;  %s45_s17 = sld [smem:[#allocation2 + $0x1]] }
   0xd   :  { %s58_s27 = scalar_lea.hbm %s109_s1, 16 }
   0xe   :  { %p59_p3 = scmp.ne.s32.totalorder %s109_s1, %s58_s27  ;;  %p62_p4 = scmp.lt.u32.totalorder %s58_s27, %s109_s1 }
  0x10   :  { %p64_p5 = pnand %p62_p4, %p59_p3 }
  0x12   :  { %s22_s18 = ssub.f32 1.0, %s20_s16  ;;  %s23_s19 = smul.f32 %s20_s16, %s20_s16 }
  0x14   :  { %s24_s20 = ssub.f32 %s45_s17, %s23_s19  ;;  %s25_s21 = smul.f32 %s22_s18, %s22_s18 }
  0x16   :  { %s26_s22 = smul.f32 100.0, %s24_s20 }
  0x18   :  { %s27_s23 = smul.f32 %s26_s22, %s24_s20 }
  0x1a   :  { %s28_s24 = sadd.f32 %s27_s23, %s25_s21 }
  0x1c   :  { %30 = sst [smem:[#allocation5]] %s28_s24 }
  0x1d   :  { %67 = shalt.err (!%p64_p5)
}
  0x1e   :  { %s73_s2 = smov [#allocation5]  }
  0x1f   :  { %38 = dma.smem_to_hbm %s73_s2, 16, %s109_s1, [#allocation4]  }
  0x20   :  { %70 = dma.done.wait [#allocation4], 16  }
  0x21   :  { %71 = vsyncadd [#allocation4], 4294967280 }
  0x22   :  { %42 = sfence }
  0x23   :  { %43 = vsyncpa [#allocation3], 1 }
  0x24   :  { %44 = vsyncpa [#allocation4], 1 }

</bundles_post_ra>
